<compile_context>
chip_gen: v6e
topology: v6e:2x2x1
jax: 0.10.0
libtpu: 0.0.40
codegen_flags: <defaults>
</compile_context>

<pallas_src>
import functools

import numpy as np
import jax
import jax.numpy as jnp
from jax.experimental import pallas as pl
from jax.experimental.pallas import tpu as pltpu


_LANE = 128
_SUBLANE = 8
_TARGET_BLOCK_BYTES = 8 * 1024 * 1024   # per double-buffered tile
_VMEM_LIMIT_BYTES = 40 * 1024 * 1024    # < 64 MiB physical on v7x
_SMALL_FALLBACK_ELEMS = 64 * 1024       # below ~256 KiB f32, fused XLA reduce wins


def _round_up(x: int, m: int) -> int:
    return ((x + m - 1) // m) * m


def _sum_over_n_kernel(x_ref, o_ref, *, n_tail):
    """Sum the (n_blk, c_blk, hw_blk) tile over its leading axis into o_ref.

    o_ref is the float32 (c_blk, hw_blk) output block; its BlockSpec returns the
    same block index across the (innermost) reduction axis, so it stays resident
    in VMEM and serves as the accumulator.
    """
    ni = pl.program_id(2)
    nn = pl.num_programs(2)

    @pl.when(ni == 0)
    def _init():
        o_ref[...] = jnp.zeros_like(o_ref)

    x = x_ref[...]  # (n_blk, c_blk, hw_blk)

    def _accumulate(blk):
        # Reduce over the leading (non-vreg) axis: plain VPU adds, f32 accumulate.
        o_ref[...] += jnp.sum(blk, axis=0, dtype=jnp.float32)

    if n_tail == 0:
        _accumulate(x)
    else:
        # Mask only on the final reduction step (padded rows past N are garbage).
        @pl.when(ni < nn - 1)
        def _steady():
            _accumulate(x)

        @pl.when(ni == nn - 1)
        def _last():
            keep = jax.lax.broadcasted_iota(jnp.int32, x.shape, 0) < n_tail
            _accumulate(jnp.where(keep, x, jnp.zeros_like(x)))


def _pick_lane_tile(hw: int) -> int:
    """Lane tile over H*W: full width unless large and 128-divisible."""
    if hw % _LANE != 0 or hw <= 1024:
        return hw
    for cand in (2048, 1024, 512):  # >=512 lanes per strided DMA chunk
        if hw % cand == 0 and hw // cand >= 2:  # >=2 tiles: keep both v7x TCs busy
            return cand
    return hw


def _pick_c_tile(c: int, hw_pad: int) -> int:
    """Sublane tile over C: full extent, or a multiple-of-8 divisor of C."""
    cands = [c]
    if c % _SUBLANE == 0:
        cands += [m for m in (2048, 1024, 512, 256, 128, 64, 32, 16, 8)
                  if m < c and c % m == 0]
    for cand in cands:
        if _round_up(cand, _SUBLANE) * hw_pad * 4 <= _TARGET_BLOCK_BYTES:
            return cand
    return cands[-1]


def mean_dim_tensor(x: jax.Array, *, force_pallas: bool = False) -> jax.Array:
    """Equivalent of MeanDimTensor.forward: x.mean((0, 2), keepdim=False)."""
    if not jnp.issubdtype(x.dtype, jnp.floating):
        raise TypeError("mean_dim_tensor requires a floating dtype (like torch.mean)")

    n, c, h, w = x.shape
    hw = h * w
    itemsize = np.dtype(x.dtype).itemsize
    inv_count = 1.0 / float(n * h)

    # Small-input fast path: launch + grid overhead dominates tiny tensors.
    if not force_pallas and x.size < _SMALL_FALLBACK_ELEMS:
        return jnp.mean(x, axis=(0, 2)).astype(x.dtype)

    # Free reshape (contiguous trailing-dim merge): no extra HBM pass.
    x3 = x.reshape(n, c, hw)

    # --- Tile selection -------------------------------------------------------
    hw_blk = _pick_lane_tile(hw)
    hw_pad = _round_up(hw_blk, _LANE)
    c_blk = _pick_c_tile(c, hw_pad)
    c_pad = _round_up(c_blk, _SUBLANE)

    row_bytes = c_pad * hw_pad * itemsize          # one n-slab of the input tile
    n_blk = max(1, _TARGET_BLOCK_BYTES // row_bytes)
    n_blk = min(n_blk, n)
    if n % n_blk != 0:
        # Prefer a nearby exact divisor of N so the mask path is never compiled.
        for cand in range(n_blk, max(1, n_blk // 2) - 1, -1):
            if n % cand == 0:
                n_blk = cand
                break
    n_tail = n % n_blk

    in_block_bytes = n_blk * row_bytes
    out_block_bytes = c_pad * hw_pad * 4
    footprint = 2 * in_block_bytes + 2 * out_block_bytes
    if footprint > _VMEM_LIMIT_BYTES - (4 << 20):
        # TODO(synk): add masked lane-tail column tiling for huge H*W that is not
        # a multiple of 128 (full-width block would not fit VMEM); fall back.
        return jnp.mean(x, axis=(0, 2)).astype(x.dtype)

    grid = (c // c_blk, hw // hw_blk, pl.cdiv(n, n_blk))  # reduction axis last

    kernel = functools.partial(_sum_over_n_kernel, n_tail=n_tail)

    sums = pl.pallas_call(
        kernel,
        out_shape=jax.ShapeDtypeStruct((c, hw), jnp.float32),
        grid_spec=pltpu.PrefetchScalarGridSpec(
            num_scalar_prefetch=0,
            grid=grid,
            in_specs=[pl.BlockSpec((n_blk, c_blk, hw_blk),
                                   lambda ci, hi, ni: (ni, ci, hi))],
            out_specs=pl.BlockSpec((c_blk, hw_blk),
                                   lambda ci, hi, ni: (ci, hi)),
        ),
        compiler_params=pltpu.CompilerParams(
            dimension_semantics=("parallel", "parallel", "arbitrary"),
            vmem_limit_bytes=_VMEM_LIMIT_BYTES,
        ),
        cost_estimate=pl.CostEstimate(
            flops=n * c * hw,
            transcendentals=0,
            bytes_accessed=n * c * hw * itemsize + c * hw * 4,
        ),
    )(x3)

    # Tiny epilogue on the (C, H*W) f32 partial: fold H and apply 1/(N*H)
    # (sum + mul decomposition of mean).  ~1/N of the input bytes.
    out = (sums.reshape(c, h, w).sum(axis=1) * inv_count).astype(x.dtype)
    return out


if __name__ == "__main__":
    key = jax.random.PRNGKey(0)
    k0, k1 = jax.random.split(key)

    # Small shape consistent with the module's 4-D input: (N, C, H, W).
    x = jax.random.uniform(k0, (2, 4, 16, 16), dtype=jnp.float32)
    out = jax.block_until_ready(mean_dim_tensor(x, force_pallas=True))
    ref = jnp.mean(x, axis=(0, 2))
    assert out.shape == (4, 16), out.shape
    assert jnp.allclose(out, ref, atol=1e-5, rtol=1e-5)

    # Original test-case shape from MeanDimTensor.get_inputs(): (4, 4, 4, 4).
    x2 = jax.random.uniform(k1, (4, 4, 4, 4), dtype=jnp.float32)
    out2 = jax.block_until_ready(mean_dim_tensor(x2, force_pallas=True))
    ref2 = jnp.mean(x2, axis=(0, 2))
    assert out2.shape == (4, 4), out2.shape
    assert jnp.allclose(out2, ref2, atol=1e-5, rtol=1e-5)

    print("KERNEL_OK")
</pallas_src>

<mosaic_0001>
module attributes {stable_mosaic.version = 11 : i64} {
  func.func @_sum_over_n_kernel(%arg0: i32, %arg1: i32, %arg2: i32, %arg3: memref<2x4x256xf32, #tpu.memory_space<vmem>>, %arg4: memref<4x256xf32, #tpu.memory_space<vmem>>) attributes {dimension_semantics = [#tpu.dimension_semantics<parallel>, #tpu.dimension_semantics<parallel>, #tpu.dimension_semantics<arbitrary>], iteration_bounds = array<i64: 1, 1, 1>, scalar_prefetch = 0 : i64, scratch_operands = 0 : i64, tpu.core_type = #tpu.core_type<tc>, window_params = [{transform_indices = @transform_0, window_bounds = array<i64: 2, 4, 256>}, {transform_indices = @transform_1, window_bounds = array<i64: 4, 256>}]} {
    %c0_i32 = arith.constant 0 : i32
    %0 = arith.cmpi eq, %arg2, %c0_i32 : i32
    %1 = arith.extui %0 : i1 to i32
    %c0_i32_0 = arith.constant 0 : i32
    %2 = arith.cmpi ne, %1, %c0_i32_0 : i32
    scf.if %2 {
      %cst_7 = arith.constant 0.000000e+00 : f32
      %8 = vector.broadcast %cst_7 : f32 to vector<4x256xf32>
      %c0_8 = arith.constant 0 : index
      %c0_9 = arith.constant 0 : index
      %9 = vector.load %arg4[%c0_8, %c0_9] : memref<4x256xf32, #tpu.memory_space<vmem>>, vector<4x256xf32>
      tpu.vector_store %arg4[%c0_8, %c0_9], %8 {strides = array<i32>} : memref<4x256xf32, #tpu.memory_space<vmem>>, vector<4x256xf32>,
    } else {
    }
    %c0 = arith.constant 0 : index
    %c0_1 = arith.constant 0 : index
    %c0_2 = arith.constant 0 : index
    %3 = vector.load %arg3[%c0, %c0_1, %c0_2] : memref<2x4x256xf32, #tpu.memory_space<vmem>>, vector<2x4x256xf32>
    %c0_3 = arith.constant 0 : index
    %c0_4 = arith.constant 0 : index
    %4 = vector.load %arg4[%c0_3, %c0_4] : memref<4x256xf32, #tpu.memory_space<vmem>>, vector<4x256xf32>
    %cst = arith.constant dense<0.000000e+00> : vector<4x256xf32>
    %5 = vector.multi_reduction <add>, %3, %cst [0] : vector<2x4x256xf32> to vector<4x256xf32>
    %6 = arith.addf %4, %5 : vector<4x256xf32>
    %c0_5 = arith.constant 0 : index
    %c0_6 = arith.constant 0 : index
    %7 = vector.load %arg4[%c0_5, %c0_6] : memref<4x256xf32, #tpu.memory_space<vmem>>, vector<4x256xf32>
    tpu.vector_store %arg4[%c0_5, %c0_6], %6 {strides = array<i32>} : memref<4x256xf32, #tpu.memory_space<vmem>>, vector<4x256xf32>,
    return
  }
  func.func @transform_0(%arg0: i32, %arg1: i32, %arg2: i32) -> (i32, i32, i32) {
    %c0_i32 = arith.constant 0 : i32
    return %arg2, %arg0, %arg1 : i32, i32, i32
  }
  func.func @transform_1(%arg0: i32, %arg1: i32, %arg2: i32) -> (i32, i32) {
    %c0_i32 = arith.constant 0 : i32
    return %arg0, %arg1 : i32, i32
  }
}

</mosaic_0001>

<bundles_post_ra>
// kernel: tpu_custom_call.1
= control target key start
LH: loop header
LB: loop body
LE: loop exit
PB: predicated region body
PF: predicated region fallthrough
CT: control target
= control target key end

     0   :  { %6 = vsyncpa [#allocation3], 0  ;;  %s136_s0 = inlined_call_operand.hbm [shape: f32[2,4,256], index: 0, kind: input, shape index: {}]   ;;  %s137_s1 = inlined_call_operand.hbm [shape: f32[4,256], index: 1, kind: output, shape index: {}]  }
   0x1   :  { %7 = vsyncpa [#allocation4], 0  ;;  %s116_s6 = smov [#allocation2]  }
   0x2   :  { %s13_s7 = sshll.u32 %s116_s6, 4  ;;  %s14_s7 = int_to_ptr.vmem [resolvable:$true] %s13_s7 }
   0x3   :  { %s80_s8 = scalar_lea.vmem %s14_s7, 256  ;;  %p85_p1 = scmp.lt.s32.totalorder %s14_s7, %s14_s7 }
   0x4   :  { %p81_p0 = scmp.ne.s32.totalorder %s14_s7, %s80_s8  ;;  %p86_p2 = scmp.lt.s32.totalorder %s80_s8, %s80_s8 }
   0x6   :  { %p87_p3 = por %p86_p2, %p85_p1 }
   0x8   :  { %p88_p4 = pnand %p87_p3, %p81_p0 }
   0xa   :  { %91 = shalt.err (!%p88_p4)
}
   0xb   :  { %s117_s9 = smov 128   ;;  %s118_s10 = smov 8  }
   0xc   :  { %19 = dma.hbm_to_vmem [thread:$0]  %s136_s0, 256, %s14_s7, [#allocation3], %s117_s9, %s117_s9, %s118_s10  }
   0xd   :  { %112 = dma.done.wait [#allocation3], 256  }
   0xe   :  { %113 = vsyncadd [#allocation3], 4294967040  ;;  %vm37_vm0 = vcmask 1043456   ;;  %v28_v0 = vld [vmem:[#allocation2] sm:$0xff]  ;;  %v29_v1 = vld [vmem:[#allocation2 + $0x8] sm:$0xff]  ;;  %s119_s13 = smov [#allocation5]  }
   0xf   :  { %v33_v2 = vcombine.high %v28_v0, %v28_v0  ;;  %v34_v3 = vcombine.high %v29_v1, %v29_v1  ;;  %v38_v4 = vsel %vm37_vm0, %v28_v0, 0.0  ;;  %v39_v5 = vsel %vm37_vm0, %v29_v1, 0.0  ;;  %s56_s14 = sshll.u32 %s119_s13, 4  ;;  %s57_s14 = int_to_ptr.vmem [resolvable:$true] %s56_s14 }
  0x10   :  { %v40_v6 = vadd.f32 %v39_v5, %v38_v4  ;;  %s92_s15 = scalar_lea.vmem %s57_s14, 128  ;;  %p97_p6 = scmp.lt.s32.totalorder %s57_s14, %s57_s14 }
  0x11   :  { %v41_v7 = vsel %vm37_vm0, %v33_v2, 0.0  ;;  %v42_v8 = vsel %vm37_vm0, %v34_v3, 0.0  ;;  %p93_p5 = scmp.ne.s32.totalorder %s57_s14, %s92_s15  ;;  %p98_p7 = scmp.lt.s32.totalorder %s92_s15, %s92_s15 }
  0x12   :  { %v43_v9 = vadd.f32 %v42_v8, %v41_v7 }
  0x13   :  { %p99_p8 = por %p98_p7, %p97_p6 }
  0x14   :  { %v46_v10 = vcombine.low %v40_v6, %v43_v9 }
  0x15   :  { %p100_p9 = pnand %p99_p8, %p93_p5 }
  0x16   :  { %49 = vst [vmem:[#allocation5] sm:$0xff] %v46_v10 }
  0x17   :  { %103 = shalt.err (!%p100_p9)
}
  0x18   :  { %59 = dma.vmem_to_hbm [thread:$0]  %s57_s14, 128, %s137_s1, [#allocation4]  }
  0x19   :  { %114 = dma.done.wait [#allocation4], 128  }
  0x1a   :  { %115 = vsyncadd [#allocation4], 4294967168 }
  0x1b   :  { %63 = vsyncpa [#allocation3], 1 }
  0x1c   :  { %64 = vsyncpa [#allocation4], 1 }

</bundles_post_ra>
